<compile_context>
chip_gen: v7x
topology: tpu7x:2x2x1
jax: 0.10.0
libtpu: 0.0.40
codegen_flags: <defaults>
</compile_context>

<pallas_src>
import functools
import math

import jax
import jax.numpy as jnp
from jax.experimental import pallas as pl
from jax.experimental.pallas import tpu as pltpu


def _mlp_kernel(hidden_layers, lane_dense_out, x_ref, *refs):
    """One batch tile of the MLP forward pass.

    refs = (w0, b0, [w_i, b_i] * hidden_layers, w_out, b_out, out_ref)

    Weights arrive in (in_features, out_features) layout, already cast to the compute
    dtype (bf16); biases are float32 with a leading broadcast dim. When lane_dense_out,
    the output weight arrives transposed as (out_size, neurons) and the output bias as
    (out_size, 1), so the tile result is written as a lane-dense (out_size, batch_tile)
    row instead of a (batch_tile, 1) column.
    """
    out_ref = refs[-1]
    p = refs[:-1]

    # Input layer: Linear + ReLU (bf16 operands, f32 accumulation on the MXU).
    h = jnp.dot(x_ref[...], p[0][...], preferred_element_type=jnp.float32)
    h = jnp.maximum(h + p[1][...], 0.0)

    # Hidden layers: Linear + ReLU (+ Dropout == identity at inference).
    # TODO(synk): training-mode dropout not implemented.
    for li in range(hidden_layers):
        w = p[2 + 2 * li]
        b = p[3 + 2 * li]
        h = jnp.dot(h.astype(w.dtype), w[...], preferred_element_type=jnp.float32)
        h = jnp.maximum(h + b[...], 0.0)

    w_out = p[-2]
    b_out = p[-1]
    if lane_dense_out:
        # y[o, m] = sum_k w_out_T[o, k] * h[m, k]  ->  (out_size, batch_tile)
        # transpose_rhs matmul: batch lands on the 128-lane axis, so the HBM writeback
        # is a dense row instead of a masked 1-lane store per batch element.
        y = jax.lax.dot_general(
            w_out[...], h.astype(w_out.dtype),
            (((1,), (1,)), ((), ())),
            preferred_element_type=jnp.float32)
        out_ref[...] = (y + b_out[...]).astype(out_ref.dtype)
    else:
        y = jnp.dot(h.astype(w_out.dtype), w_out[...],
                    preferred_element_type=jnp.float32)
        out_ref[...] = (y + b_out[...]).astype(out_ref.dtype)


def _round_up(x, m):
    return ((x + m - 1) // m) * m


def neural_network_forward(x, params, *, hidden_layers, batch_tile=None,
                           compute_dtype=jnp.bfloat16,
                           vmem_budget_bytes=12 * 1024 * 1024):
    """Run the MLP forward pass with a single tiled Pallas kernel.

    x: (B, input_size) float32 (cast to `compute_dtype` for the MXU inside).
    params: flat list [W0, b0, W1, b1, ..., W_out, b_out] with W_i shaped
            (in_features, out_features) and b_i shaped (1, out_features), float32.
    """
    B, input_size = x.shape
    out_size = params[-1].shape[-1]
    neurons = params[0].shape[-1]
    lane_dense_out = (out_size == 1)

    compute_dtype = jnp.dtype(compute_dtype)
    # Sublane alignment of the batch tile: 8 rows for 4-byte dtypes, 16 for bf16.
    align = 8 if compute_dtype.itemsize == 4 else 16

    # ---- choose the batch tile ------------------------------------------------
    # Explicit tiling (instead of batch_tile == B) so the x DMA pipelines against
    # compute and the grid can be sharded across TensorCores on v7x.
    if batch_tile is None:
        target = 512                       # ~85% of HBM roofline in the tile sweep
        batch_tile = _round_up(B, align) if B <= target else target
    batch_tile = max(align, _round_up(batch_tile, align))

    # Cap the tile so the double-buffered working set stays under the smallest
    # scoped-VMEM default (16 MiB on v5e) -> same code path on v5e/v6e/v7x, no
    # vmem_limit_bytes override needed.
    def est_bytes(bt):
        x_blk = bt * input_size * compute_dtype.itemsize
        out_blk = bt * out_size * 4
        p_bytes = 0
        for i, p in enumerate(params):
            itm = 4 if (i % 2 == 1) else compute_dtype.itemsize  # biases stay f32
            p_bytes += p.size * itm
        act = 2 * bt * max(neurons, input_size) * 4              # f32 activations
        return 2 * (x_blk + out_blk + p_bytes) + act             # 2x: double buffering

    while batch_tile > align and est_bytes(batch_tile) > vmem_budget_bytes:
        batch_tile = max(align, _round_up(batch_tile // 2, align))

    # ---- pad the batch to a multiple of the tile (padded rows sliced off) ------
    B_pad = _round_up(B, batch_tile)
    x = x.astype(compute_dtype)
    if B_pad != B:
        x = jnp.pad(x, ((0, B_pad - B), (0, 0)))
    num_tiles = B_pad // batch_tile

    # ---- kernel operands: bf16 weights, f32 biases ------------------------------
    kparams = []
    for i, p in enumerate(params):
        kparams.append(p.astype(compute_dtype) if i % 2 == 0 else p.astype(jnp.float32))
    if lane_dense_out:
        kparams[-2] = kparams[-2].T        # (out_size, neurons)
        kparams[-1] = kparams[-1].T        # (out_size, 1)

    in_specs = [pl.BlockSpec((batch_tile, input_size), lambda i: (i, 0))]
    for p in kparams:
        # Parameters are tiny and constant across grid steps; full-array blocks.
        # TODO(synk): pipeline_mode=pl.Buffered(1) to drop the redundant second buffer.
        in_specs.append(pl.BlockSpec(p.shape, lambda i: (0, 0)))

    if lane_dense_out:
        out_shape = jax.ShapeDtypeStruct((num_tiles, batch_tile), jnp.float32)
        out_spec = pl.BlockSpec((1, batch_tile), lambda i: (i, 0))
    else:
        out_shape = jax.ShapeDtypeStruct((B_pad, out_size), jnp.float32)
        out_spec = pl.BlockSpec((batch_tile, out_size), lambda i: (i, 0))

    kernel = functools.partial(_mlp_kernel, hidden_layers, lane_dense_out)

    out = pl.pallas_call(
        kernel,
        out_shape=out_shape,
        grid_spec=pltpu.PrefetchScalarGridSpec(
            num_scalar_prefetch=0,
            grid=(num_tiles,),
            in_specs=in_specs,
            out_specs=out_spec,
        ),
        compiler_params=pltpu.CompilerParams(
            dimension_semantics=("parallel",)),
    )(x, *kparams)

    if lane_dense_out:
        out = out.reshape(B_pad, 1)
    return out[:B]


def init_params(key, input_size, output_size, hidden_layers, neurons):
    """Deterministic init mimicking nn.Linear default (uniform +/- 1/sqrt(fan_in)).

    Weights are stored as (in_features, out_features); biases as (1, out_features).
    """
    dims = [input_size] + [neurons] * (hidden_layers + 1) + [output_size]
    params = []
    for li in range(len(dims) - 1):
        fan_in, fan_out = dims[li], dims[li + 1]
        key, kw, kb = jax.random.split(key, 3)
        bound = 1.0 / math.sqrt(fan_in)
        w = jax.random.uniform(kw, (fan_in, fan_out), jnp.float32, -bound, bound)
        b = jax.random.uniform(kb, (1, fan_out), jnp.float32, -bound, bound)
        params += [w, b]
    return params


def reference_forward(x, params, hidden_layers, compute_dtype=jnp.bfloat16):
    """Pure-JAX reference mirroring the kernel's dtype strategy (bf16 ops, f32 accum)."""
    cd = compute_dtype
    h = jnp.dot(x.astype(cd), params[0].astype(cd),
                preferred_element_type=jnp.float32) + params[1]
    h = jnp.maximum(h, 0.0)
    for li in range(hidden_layers):
        w, b = params[2 + 2 * li].astype(cd), params[3 + 2 * li]
        h = jnp.dot(h.astype(cd), w, preferred_element_type=jnp.float32) + b
        h = jnp.maximum(h, 0.0)
    return jnp.dot(h.astype(cd), params[-2].astype(cd),
                   preferred_element_type=jnp.float32) + params[-1]


if __name__ == "__main__":
    # Small shapes consistent with the module's forward.
    input_size = 16
    output_size = 1
    hidden_layers = 2
    neurons = 32
    dropout = 0.5  # inference mode -> identity

    key = jax.random.PRNGKey(0)
    key, kp = jax.random.split(key)
    params = init_params(kp, input_size, output_size, hidden_layers, neurons)

    # Case 1: tiny batch (single grid step, full-array blocks).
    key, kx = jax.random.split(key)
    x_small = jax.random.normal(kx, (8, input_size), dtype=jnp.float32)
    out_small = jax.block_until_ready(
        neural_network_forward(x_small, params, hidden_layers=hidden_layers))
    ref_small = reference_forward(x_small, params, hidden_layers)
    assert out_small.shape == (8, output_size)
    assert jnp.allclose(out_small, ref_small, atol=2e-3, rtol=2e-3), "small-batch mismatch"

    # Case 2: larger, non-divisible batch exercising the tiled/pipelined path
    # (4 x 512-row tiles, zero-padded remainder, lane-dense output rows).
    key, kx2 = jax.random.split(key)
    x_big = jax.random.normal(kx2, (2000, input_size), dtype=jnp.float32)
    out_big = jax.block_until_ready(
        neural_network_forward(x_big, params, hidden_layers=hidden_layers))
    ref_big = reference_forward(x_big, params, hidden_layers)
    assert out_big.shape == (2000, output_size)
    assert jnp.allclose(out_big, ref_big, atol=2e-3, rtol=2e-3), "tiled-batch mismatch"

    print("KERNEL_OK")
</pallas_src>

<mosaic_0001>
module attributes {stable_mosaic.version = 11 : i64} {
  func.func @_mlp_kernel(%arg0: i32, %arg1: memref<16x16xbf16, #tpu.memory_space<vmem>>, %arg2: memref<16x32xbf16, #tpu.memory_space<vmem>>, %arg3: memref<1x32xf32, #tpu.memory_space<vmem>>, %arg4: memref<32x32xbf16, #tpu.memory_space<vmem>>, %arg5: memref<1x32xf32, #tpu.memory_space<vmem>>, %arg6: memref<32x32xbf16, #tpu.memory_space<vmem>>, %arg7: memref<1x32xf32, #tpu.memory_space<vmem>>, %arg8: memref<1x32xbf16, #tpu.memory_space<vmem>>, %arg9: memref<1x1xf32, #tpu.memory_space<vmem>>, %arg10: memref<1x16xf32, #tpu.memory_space<vmem>>) attributes {dimension_semantics = [#tpu.dimension_semantics<parallel>], iteration_bounds = array<i64: 1>, scalar_prefetch = 0 : i64, scratch_operands = 0 : i64, tpu.core_type = #tpu.core_type<tc>, window_params = [{transform_indices = @transform_0, window_bounds = array<i64: 16, 16>}, {pipeline_mode = #tpu.pipeline_mode<synchronous>, transform_indices = @transform_1, window_bounds = array<i64: 16, 32>}, {pipeline_mode = #tpu.pipeline_mode<synchronous>, transform_indices = @transform_2, window_bounds = array<i64: 1, 32>}, {pipeline_mode = #tpu.pipeline_mode<synchronous>, transform_indices = @transform_3, window_bounds = array<i64: 32, 32>}, {pipeline_mode = #tpu.pipeline_mode<synchronous>, transform_indices = @transform_4, window_bounds = array<i64: 1, 32>}, {pipeline_mode = #tpu.pipeline_mode<synchronous>, transform_indices = @transform_5, window_bounds = array<i64: 32, 32>}, {pipeline_mode = #tpu.pipeline_mode<synchronous>, transform_indices = @transform_6, window_bounds = array<i64: 1, 32>}, {pipeline_mode = #tpu.pipeline_mode<synchronous>, transform_indices = @transform_7, window_bounds = array<i64: 1, 32>}, {pipeline_mode = #tpu.pipeline_mode<synchronous>, transform_indices = @transform_8, window_bounds = array<i64: 1, 1>}, {transform_indices = @transform_9, window_bounds = array<i64: 1, 16>}]} {
    %c0 = arith.constant 0 : index
    %c0_0 = arith.constant 0 : index
    %0 = vector.load %arg1[%c0, %c0_0] : memref<16x16xbf16, #tpu.memory_space<vmem>>, vector<16x16xbf16>
    %c0_1 = arith.constant 0 : index
    %c0_2 = arith.constant 0 : index
    %1 = vector.load %arg2[%c0_1, %c0_2] : memref<16x32xbf16, #tpu.memory_space<vmem>>, vector<16x32xbf16>
    %cst = arith.constant dense<0.000000e+00> : vector<16x32xf32>
    %2 = tpu.matmul %0, %1, %cst {dimension_numbers = #tpu.dot_dimension_numbers<[1], [0], [0], [1], [0, 0, 1, 1], [], []>} : vector<16x16xbf16>, vector<16x32xbf16>, vector<16x32xf32> -> vector<16x32xf32>
    %c0_3 = arith.constant 0 : index
    %c0_4 = arith.constant 0 : index
    %3 = vector.load %arg3[%c0_3, %c0_4] : memref<1x32xf32, #tpu.memory_space<vmem>>, vector<1x32xf32>
    %4 = vector.broadcast %3 : vector<1x32xf32> to vector<16x32xf32>
    %5 = arith.addf %2, %4 : vector<16x32xf32>
    %cst_5 = arith.constant 0.000000e+00 : f32
    %6 = vector.broadcast %cst_5 : f32 to vector<16x32xf32>
    %7 = arith.maximumf %5, %6 : vector<16x32xf32>
    %8 = arith.truncf %7 : vector<16x32xf32> to vector<16x32xbf16>
    %c0_6 = arith.constant 0 : index
    %c0_7 = arith.constant 0 : index
    %9 = vector.load %arg4[%c0_6, %c0_7] : memref<32x32xbf16, #tpu.memory_space<vmem>>, vector<32x32xbf16>
    %cst_8 = arith.constant dense<0.000000e+00> : vector<16x32xf32>
    %10 = tpu.matmul %8, %9, %cst_8 {dimension_numbers = #tpu.dot_dimension_numbers<[1], [0], [0], [1], [0, 0, 1, 1], [], []>} : vector<16x32xbf16>, vector<32x32xbf16>, vector<16x32xf32> -> vector<16x32xf32>
    %c0_9 = arith.constant 0 : index
    %c0_10 = arith.constant 0 : index
    %11 = vector.load %arg5[%c0_9, %c0_10] : memref<1x32xf32, #tpu.memory_space<vmem>>, vector<1x32xf32>
    %12 = vector.broadcast %11 : vector<1x32xf32> to vector<16x32xf32>
    %13 = arith.addf %10, %12 : vector<16x32xf32>
    %cst_11 = arith.constant 0.000000e+00 : f32
    %14 = vector.broadcast %cst_11 : f32 to vector<16x32xf32>
    %15 = arith.maximumf %13, %14 : vector<16x32xf32>
    %16 = arith.truncf %15 : vector<16x32xf32> to vector<16x32xbf16>
    %c0_12 = arith.constant 0 : index
    %c0_13 = arith.constant 0 : index
    %17 = vector.load %arg6[%c0_12, %c0_13] : memref<32x32xbf16, #tpu.memory_space<vmem>>, vector<32x32xbf16>
    %cst_14 = arith.constant dense<0.000000e+00> : vector<16x32xf32>
    %18 = tpu.matmul %16, %17, %cst_14 {dimension_numbers = #tpu.dot_dimension_numbers<[1], [0], [0], [1], [0, 0, 1, 1], [], []>} : vector<16x32xbf16>, vector<32x32xbf16>, vector<16x32xf32> -> vector<16x32xf32>
    %c0_15 = arith.constant 0 : index
    %c0_16 = arith.constant 0 : index
    %19 = vector.load %arg7[%c0_15, %c0_16] : memref<1x32xf32, #tpu.memory_space<vmem>>, vector<1x32xf32>
    %20 = vector.broadcast %19 : vector<1x32xf32> to vector<16x32xf32>
    %21 = arith.addf %18, %20 : vector<16x32xf32>
    %cst_17 = arith.constant 0.000000e+00 : f32
    %22 = vector.broadcast %cst_17 : f32 to vector<16x32xf32>
    %23 = arith.maximumf %21, %22 : vector<16x32xf32>
    %c0_18 = arith.constant 0 : index
    %c0_19 = arith.constant 0 : index
    %24 = vector.load %arg8[%c0_18, %c0_19] : memref<1x32xbf16, #tpu.memory_space<vmem>>, vector<1x32xbf16>
    %25 = arith.truncf %23 : vector<16x32xf32> to vector<16x32xbf16>
    %cst_20 = arith.constant dense<0.000000e+00> : vector<1x16xf32>
    %26 = tpu.matmul %24, %25, %cst_20 {dimension_numbers = #tpu.dot_dimension_numbers<[1], [1], [0], [0], [0, 0, 1, 0], [], []>} : vector<1x32xbf16>, vector<16x32xbf16>, vector<1x16xf32> -> vector<1x16xf32>
    %c0_21 = arith.constant 0 : index
    %c0_22 = arith.constant 0 : index
    %27 = vector.load %arg9[%c0_21, %c0_22] : memref<1x1xf32, #tpu.memory_space<vmem>>, vector<1x1xf32>
    %28 = vector.broadcast %27 : vector<1x1xf32> to vector<1x16xf32>
    %29 = arith.addf %26, %28 : vector<1x16xf32>
    %c0_23 = arith.constant 0 : index
    %c0_24 = arith.constant 0 : index
    %30 = vector.load %arg10[%c0_23, %c0_24] : memref<1x16xf32, #tpu.memory_space<vmem>>, vector<1x16xf32>
    tpu.vector_store %arg10[%c0_23, %c0_24], %29 {strides = array<i32>} : memref<1x16xf32, #tpu.memory_space<vmem>>, vector<1x16xf32>,
    return
  }
  func.func @transform_0(%arg0: i32) -> (i32, i32) {
    %c0_i32 = arith.constant 0 : i32
    %c0_i32_0 = arith.constant 0 : i32
    return %arg0, %c0_i32 : i32, i32
  }
  func.func @transform_1(%arg0: i32) -> (i32, i32) {
    %c0_i32 = arith.constant 0 : i32
    %c0_i32_0 = arith.constant 0 : i32
    %c0_i32_1 = arith.constant 0 : i32
    return %c0_i32, %c0_i32_0 : i32, i32
  }
  func.func @transform_2(%arg0: i32) -> (i32, i32) {
    %c0_i32 = arith.constant 0 : i32
    %c0_i32_0 = arith.constant 0 : i32
    %c0_i32_1 = arith.constant 0 : i32
    return %c0_i32, %c0_i32_0 : i32, i32
  }
  func.func @transform_3(%arg0: i32) -> (i32, i32) {
    %c0_i32 = arith.constant 0 : i32
    %c0_i32_0 = arith.constant 0 : i32
    %c0_i32_1 = arith.constant 0 : i32
    return %c0_i32, %c0_i32_0 : i32, i32
  }
  func.func @transform_4(%arg0: i32) -> (i32, i32) {
    %c0_i32 = arith.constant 0 : i32
    %c0_i32_0 = arith.constant 0 : i32
    %c0_i32_1 = arith.constant 0 : i32
    return %c0_i32, %c0_i32_0 : i32, i32
  }
  func.func @transform_5(%arg0: i32) -> (i32, i32) {
    %c0_i32 = arith.constant 0 : i32
    %c0_i32_0 = arith.constant 0 : i32
    %c0_i32_1 = arith.constant 0 : i32
    return %c0_i32, %c0_i32_0 : i32, i32
  }
  func.func @transform_6(%arg0: i32) -> (i32, i32) {
    %c0_i32 = arith.constant 0 : i32
    %c0_i32_0 = arith.constant 0 : i32
    %c0_i32_1 = arith.constant 0 : i32
    return %c0_i32, %c0_i32_0 : i32, i32
  }
  func.func @transform_7(%arg0: i32) -> (i32, i32) {
    %c0_i32 = arith.constant 0 : i32
    %c0_i32_0 = arith.constant 0 : i32
    %c0_i32_1 = arith.constant 0 : i32
    return %c0_i32, %c0_i32_0 : i32, i32
  }
  func.func @transform_8(%arg0: i32) -> (i32, i32) {
    %c0_i32 = arith.constant 0 : i32
    %c0_i32_0 = arith.constant 0 : i32
    %c0_i32_1 = arith.constant 0 : i32
    return %c0_i32, %c0_i32_0 : i32, i32
  }
  func.func @transform_9(%arg0: i32) -> (i32, i32) {
    %c0_i32 = arith.constant 0 : i32
    %c0_i32_0 = arith.constant 0 : i32
    return %arg0, %c0_i32 : i32, i32
  }
}

</mosaic_0001>

<bundles_post_ra>
// kernel: tpu_custom_call.1
= control target key start
LH: loop header
LB: loop body
LE: loop exit
PB: predicated region body
PF: predicated region fallthrough
CT: control target
= control target key end

     0   :  { %s676_s0 = inlined_call_operand.hbm [shape: bf16[16,16], index: 0, kind: input, shape index: {}]   ;;  %s677_s1 = inlined_call_operand.hbm [shape: bf16[16,32], index: 1, kind: input, shape index: {}]   ;;  %s678_s2 = inlined_call_operand.vmem [shape: f32[1,32], index: 2, kind: input, shape index: {}]   ;;  %s679_s3 = inlined_call_operand.hbm [shape: bf16[32,32], index: 3, kind: input, shape index: {}]   ;;  %s680_s4 = inlined_call_operand.vmem [shape: f32[1,32], index: 4, kind: input, shape index: {}]   ;;  %s681_s5 = inlined_call_operand.vmem [shape: bf16[32,32], index: 5, kind: input, shape index: {}]   ;;  %s682_s6 = inlined_call_operand.vmem [shape: f32[1,32], index: 6, kind: input, shape index: {}]   ;;  %s683_s7 = inlined_call_operand.vmem [shape: bf16[1,32], index: 7, kind: input, shape index: {}]   ;;  %s684_s8 = inlined_call_operand.<no memory space> [shape: f32[1,1], index: 8, kind: input, shape index: {}]   ;;  %s685_s9 = inlined_call_operand.hbm [shape: f32[1,16], index: 9, kind: output, shape index: {}]  }
   0x1   :  { %v14_v0 = vstv %s684_s8 }
   0x2   :  { %15 = vst [vmem:[#allocation2] sm:$0x1] %v14_v0 }
   0x3   :  { %16 = vsyncpa [#allocation4], 0 }
   0x4   :  { %17 = vsyncpa [#allocation7], 0 }
   0x5   :  { %18 = vsyncpa [#allocation5], 0  ;;  %s524_s11 = smov [#allocation6]   ;;  %s525_s13 = smov [#allocation3]  }
   0x6   :  { %s36_s12 = sshll.u32 %s524_s11, 4  ;;  %s24_s14 = sshll.u32 %s525_s13, 4  ;;  %s37_s12 = int_to_ptr.vmem [resolvable:$true] %s36_s12  ;;  %s586_s14 = int_to_ptr.vmem [resolvable:$true] %s24_s14 }
   0x7   :  { %s430_s17 = scalar_lea.hbm %s677_s1, 128 }
   0x8   :  { %p431_p0 = scmp.ne.s32.totalorder %s677_s1, %s430_s17  ;;  %p434_p1 = scmp.lt.u32.totalorder %s430_s17, %s677_s1 }
   0xa   :  { %p436_p2 = pnand %p434_p1, %p431_p0 }
   0xc   :  { %439 = shalt.err (!%p436_p2)
}
   0xd   :  { %s440_s21 = scalar_lea.vmem %s37_s12, 128  ;;  %p445_p4 = scmp.lt.s32.totalorder %s37_s12, %s37_s12 }
   0xe   :  { %p441_p3 = scmp.ne.s32.totalorder %s37_s12, %s440_s21  ;;  %p446_p5 = scmp.lt.s32.totalorder %s440_s21, %s440_s21 }
  0x10   :  { %p447_p6 = por %p446_p5, %p445_p4 }
  0x12   :  { %p448_p7 = pnand %p447_p6, %p441_p3 }
  0x14   :  { %451 = shalt.err (!%p448_p7)
}
  0x15   :  { %s526_s22 = smov 64   ;;  %s527_s23 = smov 4  }
  0x16   :  { %42 = dma.hbm_to_vmem [thread:$0]  %s677_s1, 128, %s37_s12, [#allocation7], %s526_s22, %s526_s22, %s527_s23  }
  0x17   :  { %s452_s28 = scalar_lea.hbm %s676_s0, 128 }
  0x18   :  { %p453_p8 = scmp.ne.s32.totalorder %s676_s0, %s452_s28  ;;  %p456_p9 = scmp.lt.u32.totalorder %s452_s28, %s676_s0 }
  0x1a   :  { %p458_p10 = pnand %p456_p9, %p453_p8 }
  0x1c   :  { %461 = shalt.err (!%p458_p10)
}
  0x1d   :  { %s462_s13 = scalar_lea.vmem %s586_s14, 128  ;;  %p467_p12 = scmp.lt.s32.totalorder %s586_s14, %s586_s14 }
  0x1e   :  { %p463_p11 = scmp.ne.s32.totalorder %s586_s14, %s462_s13  ;;  %p468_p13 = scmp.lt.s32.totalorder %s462_s13, %s462_s13 }
  0x20   :  { %p469_p0 = por %p468_p13, %p467_p12 }
  0x22   :  { %p470_p1 = pnand %p469_p0, %p463_p11 }
  0x24   :  { %473 = shalt.err (!%p470_p1)
}
  0x25   :  { %30 = dma.hbm_to_vmem [thread:$0]  %s676_s0, 128, %s586_s14, [#allocation4], %s526_s22, %s526_s22, %s527_s23  }
  0x26   :  { %s528_s15 = smov [#allocation8]   ;;  %s474_s19 = scalar_lea.hbm %s679_s3, 256 }
  0x27   :  { %s50_s16 = sshll.u32 %s528_s15, 4  ;;  %p475_p2 = scmp.ne.s32.totalorder %s679_s3, %s474_s19  ;;  %s51_s16 = int_to_ptr.vmem [resolvable:$true] %s50_s16 }
  0x28   :  { %p478_p3 = scmp.lt.u32.totalorder %s474_s19, %s679_s3 }
  0x2a   :  { %p480_p4 = pnand %p478_p3, %p475_p2 }
  0x2c   :  { %483 = shalt.err (!%p480_p4)
}
  0x2d   :  { %s484_s25 = scalar_lea.vmem %s51_s16, 256  ;;  %p489_p6 = scmp.lt.s32.totalorder %s51_s16, %s51_s16 }
  0x2e   :  { %p485_p5 = scmp.ne.s32.totalorder %s51_s16, %s484_s25  ;;  %p490_p7 = scmp.lt.s32.totalorder %s484_s25, %s484_s25 }
  0x30   :  { %p491_p8 = por %p490_p7, %p489_p6 }
  0x32   :  { %p492_p9 = pnand %p491_p8, %p485_p5 }
  0x34   :  { %495 = shalt.err (!%p492_p9)
}
  0x35   :  { %56 = dma.hbm_to_vmem [thread:$0]  %s679_s3, 256, %s51_s16, [#allocation7], %s526_s22, %s526_s22, %s527_s23  }
  0x36   :  { %518 = dma.done.wait [#allocation4], 128  }
  0x37   :  { %519 = vsyncadd [#allocation4], 4294967168 }
  0x38   :  { %520 = dma.done.wait [#allocation7], 384  }
  0x39   :  { %521 = vsyncadd [#allocation7], 4294966912  ;;  %v529_v1 = vmov 0.0   ;;  %vm530_vm0 = vmmov 0   ;;  %v424_v2 = vld [vmem:[#allocation6] sm:$0xff]   ;;  %v425_v3 = vld [vmem:[#allocation3] sm:$0xff]   ;;  %v295_v42 = vlaneseq }
  0x3a   :  { %386 = vmatprep.subr.bf16.mxu0 %v529_v1  ;;  %388 = vmatprep.mubr.msk.bf16.mxu0 %vm530_vm0, %v529_v1  ;;  %vm99_vm1 = vcmask 130048   ;;  %v426_v4 = vld [vmem:[#allocation8] sm:$0xff]   ;;  %v427_v5 = vld [vmem:[#allocation8 + $0x8] sm:$0xff]   ;;  %vm170_vm2 = vcmask 261120   ;;  %v429_v17 = vld [vmem:[%s681_s5 + $0x8] sm:$0xff]   ;;  %v531_v29 = vmov 0  }
  0x3b   :  { %392 = vmatprep.subr.bf16.mxu1 %v529_v1  ;;  %396 = vmatprep.mubr.msk.bf16.mxu1 %vm530_vm0, %v529_v1  ;;  %v363_v6 = vld [vmem:[%s678_s2] ss:$0 sm:$0xff]  ;;  %v296_v43 = vshrl.u32 %v295_v42, 7  ;;  %vm345_vm3 = vcmask 122880  }
  0x3c   :  { %387 = vmatpush3.bf16.msra.mxu0 %v424_v2  ;;  %393 = vmatpush3.bf16.msra.mxu1 %v426_v4  ;;  %v428_v16 = vld [vmem:[%s681_s5] sm:$0xff]  }
  0x3d   :  { %400 = vmatprep.subr.bf16.mxu0 %v529_v1  ;;  %394 = vmatprep.subr.bf16.mxu1 %v529_v1  ;;  %v367_v18 = vld [vmem:[%s680_s4] ss:$0 sm:$0xff]  ;;  %v297_v44 = vsub.s32 0, %v296_v43 }
  0x3e   :  { %v289_v28 = vld [vmem:[#allocation2] sm:$0x1]  ;;  %423 = vset.pattern.permute.xlu0 %v531_v29 }
  0x3f   :  { %389 = vmatmul.mubr.msk.bf16.vlgmr.msra.gmra.mrb[0].mxu0 %vm99_vm1, %v425_v3  ;;  %292 = vperm.xlu0 %423, %v289_v28   ;;  %v371_v30 = vld [vmem:[%s682_s6] ss:$0 sm:$0xff]  ;;  %s532_s6 = smov [#allocation9]  }
  0x40   :  { %404 = vmatprep.mubr.msk.bf16.mxu0 %vm530_vm0, %v529_v1  ;;  %395 = vmatpush3.bf16.msra.mxu1 %v427_v5  ;;  %v287_v41 = vld [vmem:[%s683_s7] sm:$0x1]  ;;  %s353_s11 = sshll.u32 %s532_s6, 4  ;;  %s354_s11 = int_to_ptr.vmem [resolvable:$true] %s353_s11 }
  0x41   :  { %408 = vmatprep.subr.bf16.mxu1 %v529_v1  ;;  %401 = vmatpush3.bf16.msra.mxu0 %v428_v16  ;;  %s496_s13 = scalar_lea.vmem %s354_s11, 16  ;;  %s500_s7 = scalar_lea.vmem %s354_s11, 32 }
  0x42   :  { %402 = vmatprep.subr.bf16.mxu0 %v529_v1  ;;  %p497_p10 = scmp.ne.s32.totalorder %s354_s11, %s496_s13  ;;  %p501_p11 = scmp.lt.s32.totalorder %s354_s11, %s354_s11 }
  0x43   :  { %p502_p12 = scmp.lt.s32.totalorder %s500_s7, %s496_s13 }
  0x45   :  { %403 = vmatpush3.bf16.msra.mxu0 %v429_v17  ;;  %p503_p13 = por %p502_p12, %p501_p11 }
  0x47   :  { %p504_p0 = pnand %p503_p13, %p497_p10 }
  0xbe   :  { %v293_v45 = vpop.permute.xlu0 %292 }
  0xbf   :  { %v298_v46 = vrot.slane %v293_v45, %v297_v44 }
 0x112   :  { %v137_v7 = vpop.f32.mrb[0].mxu0 }
 0x113   :  { %v138_v8 = vadd.f32 %v363_v6, %v137_v7  ;;  %v390_v9 = vpop.f32.mrb[1].mxu0 }
 0x114   :  { %v140_v10 = vpop.f32.mrb[2].mxu0 }
 0x115   :  { %v141_v11 = vadd.f32 %v363_v6, %v140_v10  ;;  %v391_v12 = vpop.f32.mrb[3].mxu0  ;;  %v144_v13 = vmax.f32 %v138_v8, 0.0 }
 0x117   :  { %v145_v14 = vmax.f32 %v141_v11, 0.0 }
 0x119   :  { %v146_v15 = vpack.c.bf16 %v145_v14, %v144_v13 }
 0x11b   :  { %397 = vmatmul.mubr.msk.bf16.vlgmr.msra.gmra.mrb[0].mxu1 %vm170_vm2, %v146_v15 }
 0x11c   :  { %410 = vmatprep.mubr.msk.bf16.mxu1 %vm530_vm0, %v529_v1 }
 0x1ee   :  { %v208_v19 = vpop.f32.mrb[0].mxu1 }
 0x1ef   :  { %v209_v20 = vadd.f32 %v367_v18, %v208_v19  ;;  %v398_v21 = vpop.f32.mrb[1].mxu1 }
 0x1f0   :  { %v211_v22 = vpop.f32.mrb[2].mxu1 }
 0x1f1   :  { %v212_v23 = vadd.f32 %v367_v18, %v211_v22  ;;  %v399_v24 = vpop.f32.mrb[3].mxu1  ;;  %v215_v25 = vmax.f32 %v209_v20, 0.0 }
 0x1f3   :  { %v216_v26 = vmax.f32 %v212_v23, 0.0 }
 0x1f5   :  { %v217_v27 = vpack.c.bf16 %v216_v26, %v215_v25 }
 0x1f7   :  { %405 = vmatmul.mubr.msk.bf16.vlgmr.msra.gmra.mrb[4].mxu0 %vm170_vm2, %v217_v27 }
 0x2ca   :  { %v278_v31 = vpop.f32.mrb[4].mxu0 }
 0x2cb   :  { %v279_v32 = vadd.f32 %v371_v30, %v278_v31  ;;  %v406_v33 = vpop.f32.mrb[5].mxu0 }
 0x2cc   :  { %v281_v34 = vpop.f32.mrb[6].mxu0 }
 0x2cd   :  { %v282_v35 = vadd.f32 %v371_v30, %v281_v34  ;;  %v407_v36 = vpop.f32.mrb[7].mxu0  ;;  %v285_v37 = vmax.f32 %v279_v32, 0.0 }
 0x2cf   :  { %v286_v38 = vmax.f32 %v282_v35, 0.0 }
 0x2d1   :  { %v288_v39 = vpack.c.bf16 %v286_v38, %v285_v37 }
 0x2d3   :  { %v303_v40 = vsel %vm170_vm2, %v288_v39, 0 }
 0x2d4   :  { %409 = vmatpush3.bf16.xpose.msra.mxu1 %v303_v40 }
 0x2db   :  { %411 = vmatmul.mubr.msk.bf16.vlgmr.msra.gmra.mrb[4].mxu1 %vm170_vm2, %v287_v41 }
 0x3ae   :  { %v339_v47 = vpop.f32.mrb[4].mxu1 }
 0x3af   :  { %v340_v48 = vadd.f32 %v339_v47, %v298_v46  ;;  %v412_v49 = vpop.f32.mrb[5].mxu1 }
 0x3b0   :  { %v342_v50 = vpop.f32.mrb[6].mxu1 }
 0x3b1   :  { %v413_v51 = vpop.f32.mrb[7].mxu1  ;;  %346 = vst.msk [vmem:[#allocation9] sm:$0x1] %vm345_vm3, %v340_v48 }
 0x3b2   :  { %507 = shalt.err (!%p504_p0)
}
 0x3b3   :  { %s508_s15 = scalar_lea.hbm %s685_s9, 16 }
 0x3b4   :  { %p509_p1 = scmp.ne.s32.totalorder %s685_s9, %s508_s15  ;;  %p512_p2 = scmp.lt.u32.totalorder %s508_s15, %s685_s9 }
 0x3b6   :  { %p514_p3 = pnand %p512_p2, %p509_p1 }
 0x3b8   :  { %517 = shalt.err (!%p514_p3)
}
 0x3b9   :  { %356 = dma.vmem_to_hbm [thread:$0]  %s354_s11, 16, %s685_s9, [#allocation5]  }
 0x3ba   :  { %522 = dma.done.wait [#allocation5], 16  }
 0x3bb   :  { %523 = vsyncadd [#allocation5], 4294967280 }
 0x3bc   :  { %360 = vsyncpa [#allocation4], 1 }
 0x3bd   :  { %361 = vsyncpa [#allocation7], 1 }
 0x3be   :  { %362 = vsyncpa [#allocation5], 1 }

</bundles_post_ra>
